<compile_context>
chip_gen: v7x
topology: tpu7x:2x2x1
jax: 0.10.0
libtpu: 0.0.40
codegen_flags: <defaults>
</compile_context>

<pallas_src>
import functools

import jax
import jax.numpy as jnp
from jax.experimental import pallas as pl
from jax.experimental.pallas import tpu as pltpu


# ----------------------------------------------------------------------------
# Shared per-tile math
# ----------------------------------------------------------------------------
def _tile_dist(xb_ref, xc_ref, inv_temp):
    """Pairwise logits for one (row-block, col-block): contract on D directly."""
    xb = xb_ref[...].astype(jnp.float32)          # [TM, D]
    xc = xc_ref[...].astype(jnp.float32)          # [TN, D]
    dist = jax.lax.dot_general(xb, xc, (((1,), (1,)), ((), ())),
                               preferred_element_type=jnp.float32)  # [TM, TN]
    if inv_temp != 1.0:
        dist = dist * jnp.float32(inv_temp)
    return dist


def _gumbel_edge_weight(dist, u, inv_tau):
    """edge_weight = sample * (sample > 0.5), sample = sigmoid((dist+g)/tau),
    g = log(u) - log(1-u).  Written as z = exp(-(dist+g)/tau), sample = 1/(1+z)."""
    p_int = int(round(inv_tau))
    if abs(inv_tau - p_int) < 1e-6 and 1 <= p_int <= 4:
        # tau = 1/integer (module default tau = 0.5): no logs, one exp.
        t = jnp.exp(-dist) * ((1.0 - u) / u)
        z = t
        for _ in range(p_int - 1):
            z = z * t                              # tau=0.5 -> z = t*t
    else:
        z = jnp.exp(jnp.float32(inv_tau) * (jnp.log1p(-u) - jnp.log(u) - dist))
    sample = 1.0 / (1.0 + z)
    hard = z < 1.0                                 # exactly (sample > 0.5)
    return jnp.where(hard, sample, 0.0)


# ----------------------------------------------------------------------------
# Kernels
# ----------------------------------------------------------------------------
def _edge_gen_kernel_prng(seed_ref,                # SMEM scalar seed
                          xb_ref, xc_ref,          # VMEM row / col blocks of x
                          dist_ref, ew_ref,        # VMEM outputs (bf16)
                          *, inv_temp, inv_tau):
    """TPU path: logistic noise drawn with the in-kernel hardware PRNG."""
    # Hashed per-tile seed -> decorrelated streams across grid tiles.
    tile_id = pl.program_id(0) * pl.num_programs(1) + pl.program_id(1)
    pltpu.prng_seed(seed_ref[0] + tile_id * jnp.int32(-1640531535))

    dist = _tile_dist(xb_ref, xc_ref, inv_temp)

    # Uniform (0,1) noise from raw PRNG bits (mantissa trick: [1,2) - 1).
    bits = pltpu.bitcast(pltpu.prng_random_bits(dist.shape), jnp.uint32)
    fbits = jnp.bitwise_or(jnp.bitwise_and(bits, jnp.uint32(0x007FFFFF)),
                           jnp.uint32(0x3F800000))
    u = pltpu.bitcast(fbits, jnp.float32) - 1.0
    u = jnp.maximum(u, jnp.float32(1e-7))

    ew = _gumbel_edge_weight(dist, u, inv_tau)
    dist_ref[...] = dist.astype(dist_ref.dtype)
    ew_ref[...] = ew.astype(ew_ref.dtype)


def _edge_gen_kernel_noise(xb_ref, xc_ref, u_ref,  # VMEM inputs (noise precomputed)
                           dist_ref, ew_ref,
                           *, inv_temp, inv_tau):
    """Fallback path (CPU / interpret): uniform noise supplied as an input
    because Mosaic PRNG primitives have no CPU lowering."""
    dist = _tile_dist(xb_ref, xc_ref, inv_temp)
    u = jnp.maximum(u_ref[...].astype(jnp.float32), jnp.float32(1e-7))
    ew = _gumbel_edge_weight(dist, u, inv_tau)
    dist_ref[...] = dist.astype(dist_ref.dtype)
    ew_ref[...] = ew.astype(ew_ref.dtype)


# ----------------------------------------------------------------------------
# Tiling helpers
# ----------------------------------------------------------------------------
def _pick_tile(n, cap, align):
    """Largest multiple of `align` that divides n and is <= cap, else n."""
    cap = max(align, min(cap, n))
    t = (cap // align) * align
    while t >= align:
        if n % t == 0:
            return t
        t -= align
    return n


def _tiles(n, tm_cap, tn_cap):
    tm = _pick_tile(n, tm_cap, 8)      # sublane axis: multiple of 8 (or = n)
    tn = _pick_tile(n, tn_cap, 128)    # lane axis: multiple of 128 (or = n)
    # v7x megacore: guarantee at least one parallel grid axis has >= 2 even steps.
    if n // tm == 1 and n // tn == 1 and n % 16 == 0:
        tm = n // 2
    return tm, tn


def _out_specs(tm, tn):
    spec = pl.BlockSpec((tm, tn), lambda i, j: (i, j))
    return [spec, spec]


_COMPILER_PARAMS = pltpu.CompilerParams(
    dimension_semantics=("parallel", "parallel"),
    # Unlocks >=512 blocks past v5e's 16 MiB / v6e's 32 MiB scoped defaults,
    # while staying under v7x's 64 MiB physical VMEM.
    vmem_limit_bytes=48 * 1024 * 1024,
)


# ----------------------------------------------------------------------------
# Jitted dense-edge computations (dist_mat bf16, edge_weight bf16)
# ----------------------------------------------------------------------------
def _out_shapes(n):
    return [jax.ShapeDtypeStruct((n, n), jnp.bfloat16),   # dist_mat (stat)
            jax.ShapeDtypeStruct((n, n), jnp.bfloat16)]   # edge_weight (dense)


@functools.partial(jax.jit, static_argnames=("tau", "temp", "tm", "tn"))
def _edge_gen_dense_tpu(x, seed, *, tau, temp, tm, tn):
    n, d = x.shape
    kernel = functools.partial(_edge_gen_kernel_prng,
                               inv_temp=float(1.0 / temp),
                               inv_tau=float(1.0 / tau))
    return pl.pallas_call(
        kernel,
        out_shape=_out_shapes(n),
        grid_spec=pltpu.PrefetchScalarGridSpec(
            num_scalar_prefetch=0,
            grid=(n // tm, n // tn),
            in_specs=[pl.BlockSpec(memory_space=pltpu.MemorySpace.SMEM),
                      pl.BlockSpec((tm, d), lambda i, j: (i, 0)),
                      pl.BlockSpec((tn, d), lambda i, j: (j, 0))],
            out_specs=_out_specs(tm, tn)),
        compiler_params=_COMPILER_PARAMS,
    )(seed, x, x)


@functools.partial(jax.jit, static_argnames=("tau", "temp", "tm", "tn"))
def _edge_gen_dense_fallback(x, seed, *, tau, temp, tm, tn):
    n, d = x.shape
    u = jax.random.uniform(jax.random.PRNGKey(seed[0]), (n, n),
                           dtype=jnp.float32, minval=1e-7, maxval=1.0 - 1e-7)
    kernel = functools.partial(_edge_gen_kernel_noise,
                               inv_temp=float(1.0 / temp),
                               inv_tau=float(1.0 / tau))
    return pl.pallas_call(
        kernel,
        out_shape=_out_shapes(n),
        grid_spec=pltpu.PrefetchScalarGridSpec(
            num_scalar_prefetch=0,
            grid=(n // tm, n // tn),
            in_specs=[pl.BlockSpec((tm, d), lambda i, j: (i, 0)),
                      pl.BlockSpec((tn, d), lambda i, j: (j, 0)),
                      pl.BlockSpec((tm, tn), lambda i, j: (i, j))],
            out_specs=_out_specs(tm, tn)),
        compiler_params=_COMPILER_PARAMS,
    )(x, x, u)


# ----------------------------------------------------------------------------
# Public forward (module semantics)
# ----------------------------------------------------------------------------
@functools.lru_cache(maxsize=8)
def _dense_edge_index(n):
    """All (row, col) pairs, row-major.  Pure function of N -> cached."""
    rows = jax.lax.broadcasted_iota(jnp.int32, (n, n), 0).reshape(-1)
    cols = jax.lax.broadcasted_iota(jnp.int32, (n, n), 1).reshape(-1)
    return jnp.stack([rows, cols], axis=0)            # [2, N*N]


def edge_generation_forward(x, seed, *, tau=0.5, temp=1.0,
                            tm=512, tn=1024, return_stats=False):
    """Returns (edge_index, edge_weight, stats).  stats is None unless
    return_stats=True, then {'probs','mask','dist_mat'} (derived lazily)."""
    n, _ = x.shape
    tm_, tn_ = _tiles(n, tm, tn)

    if jax.default_backend() == "tpu":
        dist, ew_dense = _edge_gen_dense_tpu(x, seed, tau=tau, temp=temp,
                                             tm=tm_, tn=tn_)
    else:
        dist, ew_dense = _edge_gen_dense_fallback(x, seed, tau=tau, temp=temp,
                                                  tm=tm_, tn=tn_)

    # TODO(synk): PyTorch returns only the sampled (nonzero) edges; dynamic
    # nonzero extraction is not expressible with static Pallas/XLA shapes, so
    # a dense edge_index (cached per N) with zero weights is returned instead.
    edge_index = _dense_edge_index(n)                  # [2, N*N]  (cached)
    edge_weight = ew_dense.reshape(-1)                 # [N*N]     (bf16)

    if not return_stats:
        return edge_index, edge_weight, None

    stats = {
        "dist_mat": dist,                                      # bf16
        "probs": jax.nn.sigmoid(dist.astype(jnp.float32)),     # derived
        "mask": (ew_dense > 0).astype(jnp.int8),               # derived
    }
    # TODO(synk): forward-only; the Gumbel-Sigmoid backward (custom_vjp for
    # training the edge sampler) is not implemented here.
    return edge_index, edge_weight, stats


if __name__ == "__main__":
    key = jax.random.PRNGKey(0)

    N, D = 128, 32                      # small node-embedding problem
    x = jax.random.normal(key, (N, D), dtype=jnp.float32) * 0.1
    seed = jnp.array([12345], dtype=jnp.int32)

    # Module constants from __init__: temperature = 1.0, tau = 0.5.
    edge_index, edge_weight, stats = edge_generation_forward(
        x, seed, tau=0.5, temp=1.0, return_stats=True)
    jax.block_until_ready((edge_index, edge_weight, stats))

    dist_mat = stats["dist_mat"]
    probs = stats["probs"]
    mask = stats["mask"]

    # --- Sanity checks -------------------------------------------------------
    # Deterministic pieces vs. a pure-JAX reference (bf16 storage tolerance).
    dist_ref = (x @ x.T) / 1.0
    probs_ref = jax.nn.sigmoid(dist_ref)
    assert jnp.allclose(dist_mat.astype(jnp.float32), dist_ref,
                        atol=2e-2, rtol=1e-2)
    assert jnp.allclose(probs.astype(jnp.float32), probs_ref, atol=1e-2)

    # Stochastic pieces: structural invariants of the Gumbel-Sigmoid sampler.
    ew = edge_weight.reshape(N, N).astype(jnp.float32)
    m = mask.astype(jnp.float32)
    assert jnp.all((mask == 0) | (mask == 1))
    assert jnp.all(jnp.where(m == 0, ew == 0.0, ew > 0.49))
    assert jnp.all((ew >= 0.0) & (ew <= 1.0))
    frac = float(jnp.mean(m))
    assert 0.2 < frac < 0.8, frac

    # Dense edge_index covers every (row, col) pair in row-major order.
    assert edge_index.shape == (2, N * N)
    assert int(edge_index[0, N + 3]) == 1 and int(edge_index[1, N + 3]) == 3

    print("KERNEL_OK")
</pallas_src>

<mosaic_0001>
module attributes {stable_mosaic.version = 11 : i64} {
  func.func @_edge_gen_kernel_noise(%arg0: i32, %arg1: i32, %arg2: memref<64x32xf32, #tpu.memory_space<vmem>>, %arg3: memref<128x32xf32, #tpu.memory_space<vmem>>, %arg4: memref<64x128xf32, #tpu.memory_space<vmem>>, %arg5: memref<64x128xbf16, #tpu.memory_space<vmem>>, %arg6: memref<64x128xbf16, #tpu.memory_space<vmem>>) attributes {dimension_semantics = [#tpu.dimension_semantics<parallel>, #tpu.dimension_semantics<parallel>], iteration_bounds = array<i64: 2, 1>, scalar_prefetch = 0 : i64, scratch_operands = 0 : i64, tpu.core_type = #tpu.core_type<tc>, window_params = [{transform_indices = @transform_0, window_bounds = array<i64: 64, 32>}, {transform_indices = @transform_1, window_bounds = array<i64: 128, 32>}, {transform_indices = @transform_2, window_bounds = array<i64: 64, 128>}, {transform_indices = @transform_3, window_bounds = array<i64: 64, 128>}, {transform_indices = @transform_4, window_bounds = array<i64: 64, 128>}]} {
    %c0 = arith.constant 0 : index
    %c0_0 = arith.constant 0 : index
    %0 = vector.load %arg2[%c0, %c0_0] : memref<64x32xf32, #tpu.memory_space<vmem>>, vector<64x32xf32>
    %c0_1 = arith.constant 0 : index
    %c0_2 = arith.constant 0 : index
    %1 = vector.load %arg3[%c0_1, %c0_2] : memref<128x32xf32, #tpu.memory_space<vmem>>, vector<128x32xf32>
    %cst = arith.constant dense<0.000000e+00> : vector<64x128xf32>
    %2 = tpu.matmul %0, %1, %cst {dimension_numbers = #tpu.dot_dimension_numbers<[1], [1], [0], [0], [0, 0, 1, 0], [], []>} : vector<64x32xf32>, vector<128x32xf32>, vector<64x128xf32> -> vector<64x128xf32>
    %c0_3 = arith.constant 0 : index
    %c0_4 = arith.constant 0 : index
    %3 = vector.load %arg4[%c0_3, %c0_4] : memref<64x128xf32, #tpu.memory_space<vmem>>, vector<64x128xf32>
    %cst_5 = arith.constant 1.000000e-07 : f32
    %4 = vector.broadcast %cst_5 : f32 to vector<64x128xf32>
    %5 = arith.maximumf %3, %4 : vector<64x128xf32>
    %cst_6 = arith.constant 0.000000e+00 : f32
    %6 = vector.broadcast %cst_6 : f32 to vector<64x128xf32>
    %7 = arith.subf %6, %2 : vector<64x128xf32>
    %8 = math.exp %7 : vector<64x128xf32>
    %cst_7 = arith.constant 1.000000e+00 : f32
    %9 = vector.broadcast %cst_7 : f32 to vector<64x128xf32>
    %10 = arith.subf %9, %5 : vector<64x128xf32>
    %11 = arith.divf %10, %5 : vector<64x128xf32>
    %12 = arith.mulf %8, %11 : vector<64x128xf32>
    %13 = arith.mulf %12, %12 : vector<64x128xf32>
    %cst_8 = arith.constant 1.000000e+00 : f32
    %14 = vector.broadcast %cst_8 : f32 to vector<64x128xf32>
    %15 = arith.addf %14, %13 : vector<64x128xf32>
    %cst_9 = arith.constant 1.000000e+00 : f32
    %16 = vector.broadcast %cst_9 : f32 to vector<64x128xf32>
    %17 = arith.divf %16, %15 : vector<64x128xf32>
    %cst_10 = arith.constant 1.000000e+00 : f32
    %18 = vector.broadcast %cst_10 : f32 to vector<64x128xf32>
    %19 = arith.cmpf olt, %13, %18 : vector<64x128xf32>
    %cst_11 = arith.constant 0.000000e+00 : f32
    %20 = vector.broadcast %cst_11 : f32 to vector<64x128xf32>
    %21 = arith.select %19, %17, %20 : vector<64x128xi1>, vector<64x128xf32>
    %22 = arith.truncf %2 : vector<64x128xf32> to vector<64x128xbf16>
    %c0_12 = arith.constant 0 : index
    %c0_13 = arith.constant 0 : index
    %23 = vector.load %arg5[%c0_12, %c0_13] : memref<64x128xbf16, #tpu.memory_space<vmem>>, vector<64x128xbf16>
    tpu.vector_store %arg5[%c0_12, %c0_13], %22 {strides = array<i32>} : memref<64x128xbf16, #tpu.memory_space<vmem>>, vector<64x128xbf16>,
    %24 = arith.truncf %21 : vector<64x128xf32> to vector<64x128xbf16>
    %c0_14 = arith.constant 0 : index
    %c0_15 = arith.constant 0 : index
    %25 = vector.load %arg6[%c0_14, %c0_15] : memref<64x128xbf16, #tpu.memory_space<vmem>>, vector<64x128xbf16>
    tpu.vector_store %arg6[%c0_14, %c0_15], %24 {strides = array<i32>} : memref<64x128xbf16, #tpu.memory_space<vmem>>, vector<64x128xbf16>,
    return
  }
  func.func @transform_0(%arg0: i32, %arg1: i32) -> (i32, i32) {
    %c0_i32 = arith.constant 0 : i32
    %c0_i32_0 = arith.constant 0 : i32
    return %arg0, %c0_i32 : i32, i32
  }
  func.func @transform_1(%arg0: i32, %arg1: i32) -> (i32, i32) {
    %c0_i32 = arith.constant 0 : i32
    %c0_i32_0 = arith.constant 0 : i32
    return %arg1, %c0_i32 : i32, i32
  }
  func.func @transform_2(%arg0: i32, %arg1: i32) -> (i32, i32) {
    %c0_i32 = arith.constant 0 : i32
    return %arg0, %arg1 : i32, i32
  }
  func.func @transform_3(%arg0: i32, %arg1: i32) -> (i32, i32) {
    %c0_i32 = arith.constant 0 : i32
    return %arg0, %arg1 : i32, i32
  }
  func.func @transform_4(%arg0: i32, %arg1: i32) -> (i32, i32) {
    %c0_i32 = arith.constant 0 : i32
    return %arg0, %arg1 : i32, i32
  }
}

</mosaic_0001>

<bundles_post_ra>
// kernel: _edge_gen_dense_fallback.1
= control target key start
LH: loop header
LB: loop body
LE: loop exit
PB: predicated region body
PF: predicated region fallthrough
CT: control target
= control target key end

     0   :  { %10 = vsyncpa [#allocation3], 0  ;;  %s1731_s0 = inlined_call_operand.vmem [shape: f32[128,32], index: 0, kind: input, shape index: {}, may-alias: {0,1}]   ;;  %s1732_s1 = inlined_call_operand.vmem [shape: f32[128,32], index: 1, kind: input, shape index: {}, may-alias: {0,1}]   ;;  %s1733_s2 = inlined_call_operand.vmem [shape: f32[128,128], index: 2, kind: input, shape index: {}]   ;;  %s1734_s3 = inlined_call_operand.hbm [shape: bf16[128,128], index: 3, kind: output, shape index: {0}]   ;;  %s1735_s4 = inlined_call_operand.hbm [shape: bf16[128,128], index: 4, kind: output, shape index: {1}]  }
   0x1   :  { %12 = vsyncpa [#allocation3 + $0x1], 0 }
   0x2   :  { %13 = vsyncpa [#allocation5], 0 }
   0x3   :  { %15 = vsyncpa [#allocation5 + $0x1], 0  ;;  %s1364_s15 = smov 0   ;;  %s1366_s16 = smov 0  }
   0x4   :  { %s1368_s17 = smov 0   ;;  %s1370_s18 = smov 0  }
   0x5   :  { %s1372_s19 = smov 0   ;;  %s1374_s20 = smov 0  }
   0x6 LB: > { %s857_s21 = sadd.s32 4294967295, %s1333_s20   ;;  %s858_s22 = sadd.s32 4294967294, %s1333_s20   ;;  %s1333_s20 = sphi %s1374_s20, %s21_s20   ;;  %s1329_s19 = sphi %s1372_s19, %s1744_s19   ;;  %s1325_s18 = sphi %s1370_s18, %s1743_s18   ;;  %s1321_s17 = sphi %s1368_s17, %s1742_s17   ;;  %s1317_s16 = sphi %s1366_s16, %s1741_s16   ;;  %s1313_s15 = sphi %s1364_s15, %s1740_s15  }
   0x7   : > { %s33_s23 = sadd.s32 1, %s1329_s19  ;;  %s122_s24 = sadd.s32 1, %s1321_s17 }
   0x8   : > { %p35_p0 = scmp.ge.s32.totalorder %s33_s23, 2  ;;  %p132_p1 = scmp.ne.s32.totalorder %s1321_s17, %s1317_s16 }
   0x9   : > { %p133_p2 = scmp.eq.s32.totalorder %s857_s21, 1  ;;  %p138_p3 = scmp.ne.s32.totalorder %s1317_s16, %s1313_s15 }
   0xa   : > { %s1746_s23 = smov (%p35_p0, %s33_s23), 0  ;;  %p139_p5 = scmp.eq.s32.totalorder %s858_s22, 1 }
   0xb   : > { %p1404_p4 = por %p133_p2, %p132_p1  ;;  %s117_s26 = ssub.s32 %s1329_s19, %s1746_s23 }
   0xc   : > { %p862_p6 = scmp.ge.s32.totalorder %s1333_s20, 1  ;;  %p120_p7 = scmp.eq.s32.totalorder %s117_s26, 0 }
   0xd   : > { %p1411_p8 = por %p139_p5, %p138_p3  ;;  %p215_p9 = scmp.lt.s32.totalorder %s1333_s20, 3 }
   0xe   : > { %s1417_s28 = scalar_select %p120_p7, %s1321_s17, %s122_s24  }
   0xf   : > { %p216_p10 = pnand %p862_p6, %p215_p9 }
  0x10   : > { %v290_v0 = vld [vmem:[%s1732_s1] sm:$0xff] (!%p216_p10)  ;;  %v291_v1 = vld [vmem:[%s1732_s1 + $0x8] sm:$0xff] (!%p216_p10)  ;;  %vm306_vm0 = vcmask (!%p216_p10), 261120   ;;  %v292_v2 = vld [vmem:[%s1732_s1 + $0x10] sm:$0xff] (!%p216_p10)  ;;  %s865_s9 = sshll.u32 (!%p216_p10), %s1325_s18, 3  ;;  %s933_s24 = sshll.u32 (!%p216_p10), %s1325_s18, 9 }
  0x11   : > { %219 = sbr.rel (%p216_p10) target bundleno = 363 (0x16b), region = 32  ;;  %v1049_v3 = vpack.c.bf16 (!%p216_p10), %v291_v1, %v290_v0  ;;  %vm1431_vm1 = vmpackc.low (!%p216_p10), %vm306_vm0, %vm306_vm0  ;;  %v293_v5 = vld [vmem:[%s1732_s1 + $0x18] sm:$0xff] (!%p216_p10)  ;;  %p260_p11 = scmp.lt.s32.totalorder (!%p216_p10), %s865_s9, 15  ;;  %v294_v7 = vld [vmem:[%s1732_s1 + $0x20] sm:$0xff] (!%p216_p10) }
  0x12   : > { %v1055_v6 = vpack.c.bf16 (!%p216_p10), %v293_v5, %v292_v2  ;;  %v295_v8 = vld [vmem:[%s1732_s1 + $0x28] sm:$0xff] (!%p216_p10)  ;;  %v296_v12 = vld [vmem:[%s1732_s1 + $0x30] sm:$0xff] (!%p216_p10)  ;;  %v297_v13 = vld [vmem:[%s1732_s1 + $0x38] sm:$0xff] (!%p216_p10)  ;;  %s1626_s5 = scalar_lea.hbm (!%p216_p10), %s1734_s3, %s933_s24  ;;  %s1335_s8 = smov (!%p216_p10), [#allocation2]  }
  0x13   : > { %1051 = vmatprep.subr.msk.bf16.mxu0 (!%p216_p10), %vm1431_vm1, %v1049_v3  ;;  %1097 = vmatprep.subr.msk.bf16.mxu1 (!%p216_p10), %vm1431_vm1, %v1049_v3  ;;  %v1061_v11 = vpack.c.bf16 (!%p216_p10), %v295_v8, %v294_v7  ;;  %v1067_v14 = vpack.c.bf16 (!%p216_p10), %v297_v13, %v296_v12  ;;  %v298_v15 = vld [vmem:[%s1732_s1 + $0x40] sm:$0xff] (!%p216_p10)  ;;  %v299_v16 = vld [vmem:[%s1732_s1 + $0x48] sm:$0xff] (!%p216_p10)  ;;  %v300_v18 = vld [vmem:[%s1732_s1 + $0x50] sm:$0xff] (!%p216_p10)  ;;  %s1227_s10 = sshll.u32 (!%p216_p10), %s1335_s8, 4  ;;  %s1228_s10 = int_to_ptr.vmem [resolvable:$false] %s1227_s10 }
  0x14   : > { %1054 = vmatpush3.bf16.xpose.msk.msra.mxu0 (!%p216_p10), %vm1431_vm1, %v1049_v3  ;;  %1105 = vmatpush3.bf16.xpose.msk.msra.mxu1 (!%p216_p10), %vm1431_vm1, %v1049_v3  ;;  %v1073_v17 = vpack.c.bf16 (!%p216_p10), %v299_v16, %v298_v15  ;;  %v301_v19 = vld [vmem:[%s1732_s1 + $0x58] sm:$0xff] (!%p216_p10)  ;;  %v302_v21 = vld [vmem:[%s1732_s1 + $0x60] sm:$0xff] (!%p216_p10)  ;;  %v303_v22 = vld [vmem:[%s1732_s1 + $0x68] sm:$0xff] (!%p216_p10)  ;;  %s1229_s11 = scalar_lea.vmem (!%p216_p10), %s1228_s10, 1024 }
  0x15   : > { %1057 = vmatprep.subr.msk.bf16.mxu0 (!%p216_p10), %vm1431_vm1, %v1055_v6  ;;  %1098 = vmatprep.subr.msk.bf16.mxu1 (!%p216_p10), %vm1431_vm1, %v1055_v6  ;;  %v1079_v20 = vpack.c.bf16 (!%p216_p10), %v301_v19, %v300_v18  ;;  %v1085_v23 = vpack.c.bf16 (!%p216_p10), %v303_v22, %v302_v21  ;;  %v304_v24 = vld [vmem:[%s1732_s1 + $0x70] sm:$0xff] (!%p216_p10)  ;;  %v305_v25 = vld [vmem:[%s1732_s1 + $0x78] sm:$0xff] (!%p216_p10) }
  0x16   : > { %v1091_v26 = vpack.c.bf16 (!%p216_p10), %v305_v25, %v304_v24 }
  0x18   : > { %s1748_s9 = smov (!%p260_p11, %s865_s9), 15 }
  0x19   : > { %s866_s12 = sshll.u32 %s1748_s9, 3  ;;  %s1585_s9 = sand.u32 1, %s1317_s16  }
  0x1a   : > { %s1464_s29 = scalar_lea.vmem %s1731_s0, %s866_s12  ;;  %s278_s21 = scalar_lea.vmem %s1733_s2, %s866_s12 }
  0x1b   : > { %v282_v9 = vld [vmem:[%s1464_s29] sm:$0xff]  ;;  %v283_v27 = vld [vmem:[%s1464_s29 + $0x8] sm:$0xff]  ;;  %v284_v29 = vld [vmem:[%s1464_s29 + $0x10] sm:$0xff]  ;;  %s863_s12 = sshll.u32 %s1585_s9, 5  ;;  %s685_s6 = scalar_lea.sflag [#allocation3], %s1585_s9 }
  0x1c   : > { %v286_v10 = vld [vmem:[%s1464_s29 + $0x20] sm:$0xff]  ;;  %1037 = vmatprep.mubr.msk.f32.mxu0 %vm306_vm0, %v282_v9  ;;  %1060 = vmatpush3.bf16.xpose.msk.msra.mxu0 %vm1431_vm1, %v1055_v6  ;;  %v287_v28 = vld [vmem:[%s1464_s29 + $0x28] sm:$0xff]  ;;  %v288_v30 = vld [vmem:[%s1464_s29 + $0x30] sm:$0xff] }
  0x1d   : > { %1043 = vmatprep.mubr.msk.f32.mxu1 %vm306_vm0, %v286_v10  ;;  %1106 = vmatpush3.bf16.xpose.msk.msra.mxu1 %vm1431_vm1, %v1055_v6  ;;  %v285_v31 = vld [vmem:[%s1464_s29 + $0x18] sm:$0xff]  ;;  %v1569_v33 = vld [vmem:[%s278_s21 + $0x8] sm:$0xff]  ;;  %v1573_v35 = vld [vmem:[%s278_s21] sm:$0xff] }
  0x1e   : > { %1063 = vmatprep.subr.msk.bf16.mxu0 %vm1431_vm1, %v1061_v11  ;;  %1099 = vmatprep.subr.msk.bf16.mxu1 %vm1431_vm1, %v1061_v11  ;;  %v289_v32 = vld [vmem:[%s1464_s29 + $0x38] sm:$0xff]  ;;  %v1571_v34 = vld [vmem:[%s278_s21 + $0x28] sm:$0xff]  ;;  %v493_v36 = vmax.f32 %v1569_v33, 1e-07  ;;  %v1576_v37 = vld [vmem:[%s278_s21 + $0x20] sm:$0xff]  ;;  %s1609_s29 = scalar_lea.vmem [#allocation2], %s863_s12 }
  0x1f   : > { %v497_v38 = vmax.f32 %v1571_v34, 1e-07  ;;  %v1579_v39 = vld [vmem:[%s278_s21 + $0x18] sm:$0xff]  ;;  %v492_v40 = vmax.f32 %v1573_v35, 1e-07  ;;  %v1589_v44 = vld [vmem:[%s278_s21 + $0x10] sm:$0xff] }
  0x20   : > { %v1582_v41 = vld [vmem:[%s278_s21 + $0x38] sm:$0xff]  ;;  %v496_v42 = vmax.f32 %v1576_v37, 1e-07  ;;  %1175 = vrcp.f32 %v493_v36  ;;  %v495_v43 = vmax.f32 %v1579_v39, 1e-07  ;;  %v1594_v46 = vld [vmem:[%s278_s21 + $0x30] sm:$0xff] }
  0x21   : > { %1177 = vrcp.f32 %v497_v38  ;;  %v499_v45 = vmax.f32 %v1582_v41, 1e-07  ;;  %v494_v47 = vmax.f32 %v1589_v44, 1e-07  ;;  %v498_v50 = vmax.f32 %v1594_v46, 1e-07 }
  0x22   : > { %1179 = vrcp.f32 %v492_v40  ;;  %s704_s22 = sshll.u32 %s1609_s29, 4  ;;  %v529_v18 = vsub.f32 1.0, %v497_v38  ;;  %s1619_s22 = int_to_ptr.vmem [resolvable:$true] %s704_s22 }
  0x23   : > { %1181 = vrcp.f32 %v496_v42  ;;  %s1223_s7 = scalar_lea.vmem %s1619_s22, 512  ;;  %p1230_p1 = scmp.lt.s32.totalorder %s1619_s22, %s1228_s10 }
  0x24   : > { %1066 = vmatpush3.bf16.xpose.msk.msra.mxu0 %vm1431_vm1, %v1061_v11  ;;  %1183 = vrcp.f32 %v495_v43  ;;  %p1224_p12 = scmp.ne.s32.totalorder %s1619_s22, %s1223_s7  ;;  %p1231_p2 = scmp.lt.s32.totalorder %s1229_s11, %s1223_s7 }
  0x25   : > { %1107 = vmatpush3.bf16.xpose.msk.msra.mxu1 %vm1431_vm1, %v1061_v11  ;;  %1069 = vmatprep.subr.msk.bf16.mxu0 %vm1431_vm1, %v1067_v14  ;;  %1185 = vrcp.f32 %v499_v45 }
  0x26   : > { %1100 = vmatprep.subr.msk.bf16.mxu1 %vm1431_vm1, %v1067_v14  ;;  %1187 = vrcp.f32 %v494_v47  ;;  %p1225_p13 = pnand %p1224_p12, %p1404_p4  ;;  %p1232_p3 = por %p1231_p2, %p1230_p1 }
  0x27   : > { %1189 = vrcp.f32 %v498_v50 }
  0x28   : > { %p1226_p0 = pneg %p1225_p13 }
  0x2a   : > { %v1176_v5 = vpop.eup %1175  ;;  %p1233_p5 = pnand %p1232_p3, %p1226_p0 }
  0x2b   : > { %v1178_v9 = vpop.eup %1177 }
  0x2c   : > { %1072 = vmatpush3.bf16.xpose.msk.msra.mxu0 %vm1431_vm1, %v1067_v14  ;;  %v1180_v13 = vpop.eup %1179 }
  0x2d   : > { %1108 = vmatpush3.bf16.xpose.msk.msra.mxu1 %vm1431_vm1, %v1067_v14  ;;  %1075 = vmatprep.subr.msk.bf16.mxu0 %vm1431_vm1, %v1073_v17  ;;  %v525_v14 = vsub.f32 1.0, %v493_v36 }
  0x2e   : > { %1101 = vmatprep.subr.msk.bf16.mxu1 %vm1431_vm1, %v1073_v17 }
  0x34   : > { %1078 = vmatpush3.bf16.xpose.msk.msra.mxu0 %vm1431_vm1, %v1073_v17 }
  0x35   : > { %1109 = vmatpush3.bf16.xpose.msk.msra.mxu1 %vm1431_vm1, %v1073_v17  ;;  %1081 = vmatprep.subr.msk.bf16.mxu0 %vm1431_vm1, %v1079_v20  ;;  %v1182_v17 = vpop.eup %1181 }
  0x36   : > { %1102 = vmatprep.subr.msk.bf16.mxu1 %vm1431_vm1, %v1079_v20  ;;  %v1184_v19 = vpop.eup %1183 }
  0x3c   : > { %1084 = vmatpush3.bf16.xpose.msk.msra.mxu0 %vm1431_vm1, %v1079_v20 }
  0x3d   : > { %1110 = vmatpush3.bf16.xpose.msk.msra.mxu1 %vm1431_vm1, %v1079_v20  ;;  %1087 = vmatprep.subr.msk.bf16.mxu0 %vm1431_vm1, %v1085_v23  ;;  %v524_v20 = vsub.f32 1.0, %v492_v40 }
  0x3e   : > { %1103 = vmatprep.subr.msk.bf16.mxu1 %vm1431_vm1, %v1085_v23 }
  0x44   : > { %1090 = vmatpush3.bf16.xpose.msk.msra.mxu0 %vm1431_vm1, %v1085_v23 }
  0x45   : > { %1111 = vmatpush3.bf16.xpose.msk.msra.mxu1 %vm1431_vm1, %v1085_v23  ;;  %1093 = vmatprep.subr.msk.bf16.mxu0 %vm1431_vm1, %v1091_v26 }
  0x46   : > { %1104 = vmatprep.subr.msk.bf16.mxu1 %vm1431_vm1, %v1091_v26 }
  0x4c   : > { %1096 = vmatpush3.bf16.xpose.msk.msra.mxu0 %vm1431_vm1, %v1091_v26 }
  0x4d   : > { %1112 = vmatpush3.bf16.xpose.msk.msra.mxu1 %vm1431_vm1, %v1091_v26 }
  0x53   : > { %1038 = vmatmul.mubr.msk.f32.vlgmr.msra.gmra.mrb[0].mxu0 %vm306_vm0, %v283_v27 }
  0x54   : > { %1044 = vmatmul.mubr.msk.f32.vlgmr.msra.gmra.mrb[0].mxu1 %vm306_vm0, %v287_v28  ;;  %1040 = vmatprep.mubr.msk.f32.mxu0 %vm306_vm0, %v284_v29 }
  0x55   : > { %1046 = vmatprep.mubr.msk.f32.mxu1 %vm306_vm0, %v288_v30 }
  0x57   : > { %1041 = vmatmul.mubr.msk.f32.gmra.mrb[2].mxu0 %vm306_vm0, %v285_v31 }
  0x58   : > { %1047 = vmatmul.mubr.msk.f32.gmra.mrb[2].mxu1 %vm306_vm0, %v289_v32 }
 0x126   : > { %v1039_v48 = vpop.f32.mrb[0].mxu0 }
 0x127   : > { %v1045_v49 = vpop.f32.mrb[0].mxu1  ;;  %v501_v51 = vsub.f32 0.0, %v1039_v48  ;;  %v445_v53 = vpop.f32.mrb[1].mxu0 }
 0x128   : > { %v505_v52 = vsub.f32 0.0, %v1045_v49  ;;  %v465_v54 = vpop.f32.mrb[1].mxu1  ;;  %v500_v55 = vsub.f32 0.0, %v445_v53  ;;  %v938_v56 = vpack.c.bf16 %v1039_v48, %v445_v53 }
 0x129   : > { %v504_v57 = vsub.f32 0.0, %v465_v54  ;;  %v948_v58 = vpack.c.bf16 %v1045_v49, %v465_v54  ;;  %v510_v59 = vmul.f32 1.442695, %v501_v51 }
 0x12a   : > { %v518_v60 = vmul.f32 1.442695, %v505_v52  ;;  %v508_v61 = vmul.f32 1.442695, %v500_v55  ;;  %939 = vst [vmem:[%s1609_s29] sm:$0xff] %v938_v56   ;;  %v1042_v63 = vpop.f32.mrb[2].mxu0 }
 0x12b   : > { %v516_v62 = vmul.f32 1.442695, %v504_v57  ;;  %976 = vst [vmem:[%s1609_s29 + $0x10] sm:$0xff] %v948_v58   ;;  %v1048_v0 = vpop.f32.mrb[2].mxu1  ;;  %1191 = vpow2.f32 %v510_v59  ;;  %v503_v1 = vsub.f32 0.0, %v1042_v63  ;;  %v455_v3 = vpop.f32.mrb[3].mxu0 }
 0x12c   : > { %v507_v2 = vsub.f32 0.0, %v1048_v0  ;;  %v475_v4 = vpop.f32.mrb[3].mxu1  ;;  %1193 = vpow2.f32 %v518_v60  ;;  %v502_v6 = vsub.f32 0.0, %v455_v3  ;;  %v943_v7 = vpack.c.bf16 %v1042_v63, %v455_v3 }
 0x12d   : > { %v506_v8 = vsub.f32 0.0, %v475_v4  ;;  %1195 = vpow2.f32 %v508_v61  ;;  %v514_v10 = vmul.f32 1.442695, %v503_v1  ;;  %v953_v12 = vpack.c.bf16 %v1048_v0, %v475_v4 }
 0x12e   : > { %v522_v11 = vmul.f32 1.442695, %v507_v2  ;;  %1197 = vpow2.f32 %v516_v62  ;;  %v512_v15 = vmul.f32 1.442695, %v502_v6  ;;  %975 = vst [vmem:[%s1609_s29 + $0x8] sm:$0xff] %v943_v7  }
 0x12f   : > { %v520_v16 = vmul.f32 1.442695, %v506_v8  ;;  %1199 = vpow2.f32 %v514_v10  ;;  %977 = vst [vmem:[%s1609_s29 + $0x18] sm:$0xff] %v953_v12  }
 0x130   : > { %1201 = vpow2.f32 %v522_v11 }
 0x131   : > { %1236 = shalt.err (!%p1233_p5)
}
 0x132   : > { %s1237_s13 = scalar_lea.hbm %s1626_s5, 512  ;;  %s1241_s29 = scalar_lea.hbm %s1734_s3, 1024 }
 0x133   : > { %p1238_p6 = scmp.ne.s32.totalorder %s1626_s5, %s1237_s13  ;;  %p1242_p10 = scmp.lt.u32.totalorder %s1626_s5, %s1734_s3 }
 0x134   : > { %p1243_p11 = scmp.lt.u32.totalorder %s1241_s29, %s1237_s13  ;;  %p1245_p13 = scmp.lt.u32.totalorder %s1237_s13, %s1626_s5 }
 0x135   : > { %p1239_p7 = pnand %p1238_p6, %p1404_p4 }
 0x136   : > { %p1244_p12 = por %p1243_p11, %p1242_p10 }
 0x137   : > { %p1240_p9 = pneg %p1239_p7 }
 0x138   : > { %p1246_p0 = por %p1245_p13, %p1244_p12 }
 0x13a   : > { %p1247_p1 = pnand %p1246_p0, %p1240_p9 }
 0x13c   : > { %1250 = shalt.err (!%p1247_p1)
}
 0x13d   : > { %s1336_s7 = smov 64   ;;  %s1337_s8 = smov 4   ;;  %v1186_v21 = vpop.eup %1185  ;;  %v528_v22 = vsub.f32 1.0, %v496_v42  ;;  %1203 = vpow2.f32 %v512_v15  ;;  %v535_v23 = vmul.f32 %v1176_v5, %v525_v14  ;;  %v527_v24 = vsub.f32 1.0, %v495_v43 }
 0x13e   : > { %1113 = dma.vmem_to_hbm [thread:$0]  (%p1404_p4), %s1619_s22, 512, %s1626_s5, %s685_s6, %s1336_s7, %s1336_s7, %s1337_s8   ;;  %1205 = vpow2.f32 %v520_v16  ;;  %v1188_v25 = vpop.eup %1187  ;;  %v543_v26 = vmul.f32 %v1178_v9, %v529_v18  ;;  %v531_v27 = vsub.f32 1.0, %v499_v45  ;;  %v533_v29 = vmul.f32 %v1180_v13, %v524_v20 }
 0x13f   : > { %v1190_v28 = vpop.eup %1189  ;;  %v541_v31 = vmul.f32 %v1182_v17, %v528_v22  ;;  %v539_v34 = vmul.f32 %v1184_v19, %v527_v24  ;;  %v526_v35 = vsub.f32 1.0, %v494_v47  ;;  %v530_v39 = vsub.f32 1.0, %v498_v50  ;;  %s258_s22 = scalar_lea.vmem [#allocation4], %s863_s12  ;;  %s1680_s10 = scalar_lea.hbm %s1735_s4, %s933_s24 }
 0x140   : > { %v1192_v30 = vpop.eup %1191  ;;  %v547_v38 = vmul.f32 %v1186_v21, %v531_v27  ;;  %s721_s5 = sshll.u32 %s258_s22, 4  ;;  %s690_s11 = scalar_lea.sflag [#allocation5], %s1585_s9  ;;  %s1673_s5 = int_to_ptr.vmem [resolvable:$true] %s721_s5 }
 0x141   : > { %v1194_v32 = vpop.eup %1193  ;;  %v549_v33 = vmul.f32 %v1192_v30, %v535_v23  ;;  %v537_v54 = vmul.f32 %v1188_v25, %v526_v35  ;;  %v545_v57 = vmul.f32 %v1190_v28, %v530_v39  ;;  %s1251_s13 = scalar_lea.vmem %s1673_s5, 512  ;;  %s1338_s14 = smov [#allocation4]  }
 0x142   : > { %v1196_v36 = vpop.eup %1195  ;;  %v553_v37 = vmul.f32 %v1194_v32, %v543_v26  ;;  %p1252_p2 = scmp.ne.s32.totalorder %s1673_s5, %s1251_s13  ;;  %s1255_s21 = sshll.u32 %s1338_s14, 4  ;;  %s1256_s21 = int_to_ptr.vmem [resolvable:$false] %s1255_s21 }
 0x143   : > { %v1198_v40 = vpop.eup %1197  ;;  %v557_v42 = vmul.f32 %v549_v33, %v549_v33  ;;  %v548_v41 = vmul.f32 %v1196_v36, %v533_v29  ;;  %s1257_s29 = scalar_lea.vmem %s1256_s21, 1024  ;;  %p1258_p6 = scmp.lt.s32.totalorder %s1673_s5, %s1256_s21 }
 0x144   : > { %v1200_v43 = vpop.eup %1199  ;;  %v561_v45 = vmul.f32 %v553_v37, %v553_v37  ;;  %v552_v48 = vmul.f32 %v1198_v40, %v541_v31  ;;  %p1253_p3 = pnand %p1252_p2, %p1404_p4  ;;  %p1259_p7 = scmp.lt.s32.totalorder %s1257_s29, %s1251_s13 }
 0x145   : > { %v1202_v49 = vpop.eup %1201  ;;  %v565_v51 = vadd.f32 1.0, %v557_v42  ;;  %v556_v52 = vmul.f32 %v548_v41, %v548_v41  ;;  %v551_v53 = vmul.f32 %v1200_v43, %v539_v34  ;;  %vm589_vm2 = vcmp.lt.f32.partialorder %v557_v42, 1.0 }
 0x146   : > { %v569_v44 = vadd.f32 1.0, %v561_v45  ;;  %v560_v47 = vmul.f32 %v552_v48, %v552_v48  ;;  %v555_v56 = vmul.f32 %v1202_v49, %v547_v38  ;;  %vm593_vm3 = vcmp.lt.f32.partialorder %v561_v45, 1.0  ;;  %p1254_p5 = pneg %p1253_p3  ;;  %p1260_p9 = por %p1259_p7, %p1258_p6 }
 0x147   : > { %v1204_v55 = vpop.eup %1203  ;;  %1207 = vrcp.f32 %v565_v51  ;;  %v564_v46 = vadd.f32 1.0, %v556_v52  ;;  %v559_v50 = vmul.f32 %v551_v53, %v551_v53  ;;  %vm588_vm4 = vcmp.lt.f32.partialorder %v556_v52, 1.0 }
 0x148   : > { %v1206_v58 = vpop.eup %1205  ;;  %1209 = vrcp.f32 %v569_v44  ;;  %v568_v59 = vadd.f32 1.0, %v560_v47  ;;  %v563_v60 = vmul.f32 %v555_v56, %v555_v56  ;;  %v550_v62 = vmul.f32 %v1204_v55, %v537_v54  ;;  %p1261_p10 = pnand %p1260_p9, %p1254_p5 }
 0x149   : > { %1211 = vrcp.f32 %v564_v46  ;;  %v567_v61 = vadd.f32 1.0, %v559_v50  ;;  %v554_v0 = vmul.f32 %v1206_v58, %v545_v57  ;;  %vm592_vm5 = vcmp.lt.f32.partialorder %v560_v47, 1.0 }
 0x14a   : > { %1213 = vrcp.f32 %v568_v59  ;;  %v571_v63 = vadd.f32 1.0, %v563_v60  ;;  %v558_v1 = vmul.f32 %v550_v62, %v550_v62  ;;  %vm591_vm6 = vcmp.lt.f32.partialorder %v559_v50, 1.0 }
 0x14b   : > { %1215 = vrcp.f32 %v567_v61  ;;  %v562_v2 = vmul.f32 %v554_v0, %v554_v0  ;;  %vm595_vm7 = vcmp.lt.f32.partialorder %v563_v60, 1.0 }
 0x14c   : > { %1217 = vrcp.f32 %v571_v63  ;;  %v566_v3 = vadd.f32 1.0, %v558_v1  ;;  %vm590_vm8 = vcmp.lt.f32.partialorder %v558_v1, 1.0 }
 0x14d   : > { %v570_v4 = vadd.f32 1.0, %v562_v2  ;;  %vm594_vm9 = vcmp.lt.f32.partialorder %v562_v2, 1.0 }
 0x14e   : > { %1219 = vrcp.f32 %v566_v3 }
 0x14f   : > { %1221 = vrcp.f32 %v570_v4 }
 0x151   : > { %v1208_v5 = vpop.eup %1207 }
 0x152   : > { %v1210_v6 = vpop.eup %1209  ;;  %v597_v7 = vsel %vm589_vm2, %v1208_v5, 0.0 }
 0x153   : > { %v1212_v8 = vpop.eup %1211  ;;  %v601_v9 = vsel %vm593_vm3, %v1210_v6, 0.0 }
 0x154   : > { %v1214_v10 = vpop.eup %1213  ;;  %v596_v11 = vsel %vm588_vm4, %v1212_v8, 0.0 }
 0x155   : > { %v1216_v12 = vpop.eup %1215  ;;  %v958_v13 = vpack.c.bf16 %v597_v7, %v596_v11  ;;  %v600_v14 = vsel %vm592_vm5, %v1214_v10, 0.0 }
 0x156   : > { %v1218_v15 = vpop.eup %1217  ;;  %v968_v16 = vpack.c.bf16 %v601_v9, %v600_v14  ;;  %v599_v17 = vsel %vm591_vm6, %v1216_v12, 0.0 }
 0x157   : > { %959 = vst [vmem:[%s258_s22] sm:$0xff] %v958_v13   ;;  %v603_v19 = vsel %vm595_vm7, %v1218_v15, 0.0 }
 0x158   : > { %979 = vst [vmem:[%s258_s22 + $0x10] sm:$0xff] %v968_v16   ;;  %v1220_v18 = vpop.eup %1219 }
 0x159   : > { %v1222_v20 = vpop.eup %1221  ;;  %v598_v21 = vsel %vm590_vm8, %v1220_v18, 0.0 }
 0x15a   : > { %v963_v22 = vpack.c.bf16 %v599_v17, %v598_v21  ;;  %v602_v23 = vsel %vm594_vm9, %v1222_v20, 0.0 }
 0x15b   : > { %v973_v24 = vpack.c.bf16 %v603_v19, %v602_v23 }
 0x15c   : > { %978 = vst [vmem:[%s258_s22 + $0x8] sm:$0xff] %v963_v22  }
 0x15d   : > { %980 = vst [vmem:[%s258_s22 + $0x18] sm:$0xff] %v973_v24  }
 0x15e   : > { %1264 = shalt.err (!%p1261_p10)
}
 0x15f   : > { %s1265_s18 = scalar_lea.hbm %s1680_s10, 512  ;;  %s1269_s30 = scalar_lea.hbm %s1735_s4, 1024 }
 0x160   : > { %p1266_p11 = scmp.ne.s32.totalorder %s1680_s10, %s1265_s18  ;;  %p1270_p0 = scmp.lt.u32.totalorder %s1680_s10, %s1735_s4 }
 0x161   : > { %p1271_p1 = scmp.lt.u32.totalorder %s1269_s30, %s1265_s18  ;;  %p1273_p3 = scmp.lt.u32.totalorder %s1265_s18, %s1680_s10 }
 0x162   : > { %p1267_p12 = pnand %p1266_p11, %p1404_p4 }
 0x163   : > { %p1272_p2 = por %p1271_p1, %p1270_p0 }
 0x164   : > { %p1268_p13 = pneg %p1267_p12 }
 0x165   : > { %p1274_p5 = por %p1273_p3, %p1272_p2 }
 0x167   : > { %p1275_p6 = pnand %p1274_p5, %p1268_p13 }
 0x169   : > { %1278 = shalt.err (!%p1275_p6)
}
 0x16a   : > { %1114 = dma.vmem_to_hbm [thread:$0]  (%p1404_p4), %s1673_s5, 512, %s1680_s10, %s690_s11, %s1336_s7, %s1336_s7, %s1337_s8  }
 0x16b PF: > { %p1124_p7 = scmp.ge.s32.totalorder %s1333_s20, 2  ;;  %s736_s6 = sand.u32 1, %s1313_s15  }
 0x16c   : > { %s737_s13 = scalar_lea.sflag [#allocation3], %s736_s6 }
 0x16d   : > { %p1118_p9 = pnand %p1124_p7, %p1411_p8 }
 0x16f   : > { %1304 = dma.done.wait (!%p1118_p9), %s737_s13, 512  }
 0x170   : > { %1306 = vsyncadd (!%p1118_p9), %s737_s13, 4294966784  ;;  %s746_s25 = scalar_lea.sflag [#allocation5], %s736_s6 }
 0x171   : > { %1308 = dma.done.wait (!%p1118_p9), %s746_s25, 512  }
 0x172   : > { %1310 = vsyncadd (!%p1118_p9), %s746_s25, 4294966784  ;;  %s21_s20 = sadd.s32 1, %s1333_s20   ;;  %s1740_s15 = smov %s1317_s16 }
 0x173   : > { %p18_p10 = scmp.ge.s32.totalorder %s21_s20, 4   ;;  %s1741_s16 = smov %s1321_s17 }
 0x174   : > { %s1742_s17 = smov %s1417_s28  ;;  %s1743_s18 = smov %s1329_s19 }
 0x175   : > { %s1744_s19 = smov %s1746_s23  ;;  %20 = sbr.rel (!%p18_p10) target bundleno = 6 (0x6), region = 90 }
 0x17c   :  { %751 = vsyncpa [#allocation3], 1 }
 0x17d   :  { %753 = vsyncpa [#allocation3 + $0x1], 1 }
 0x17e   :  { %754 = vsyncpa [#allocation5], 1 }
 0x17f   :  { %756 = vsyncpa [#allocation5 + $0x1], 1 }

</bundles_post_ra>
